<compile_context>
chip_gen: v6e
topology: v6e:2x2x1
jax: 0.10.0
libtpu: 0.0.40
codegen_flags: <defaults>
</compile_context>

<pallas_src>
import math

import jax
import jax.numpy as jnp
from jax.experimental import pallas as pl
from jax.experimental.pallas import tpu as pltpu


def _drop_path_kernel(mask_ref, x_ref, o_ref):
    # mask_ref: (bblk, 1) per-sample scale (0, 1, or 1/keep_prob) in x.dtype.
    # Broadcast across the lane (feature) axis; multiply in the input dtype.
    o_ref[...] = x_ref[...] * mask_ref[...]


def _choose_tiles(batch, feat, itemsize):
    """Pick (bblk, n_tile) targeting ~4 MiB per block, lane-dense tiles."""
    target_block_bytes = 4 << 20  # ~4 MiB per (bblk, n_tile) block

    # Feature (lane) tile: keep the full flattened feature axis unless it is
    # large and cleanly tileable in multiples of 128.
    n_tile = feat
    row_budget = max(128 * itemsize, target_block_bytes // 8)
    if feat % 128 == 0 and feat * itemsize > row_budget:
        best = 128
        t = 128
        while t * itemsize <= row_budget:
            if feat % t == 0:
                best = t
            t += 128
        n_tile = best

    # Batch (sublane) tile: as many rows as fit the byte budget.
    max_rows = max(1, target_block_bytes // (n_tile * itemsize))
    if batch <= max_rows:
        bblk = batch
    else:
        bblk = None
        m = 8
        while m <= max_rows:
            if batch % m == 0:
                bblk = m
            m += 8
        if bblk is None:  # no clean multiple-of-8 divisor: take the whole batch
            bblk = batch
    return bblk, n_tile


def _drop_path_call(x, mask):
    """x: (B, ...) activations; mask: (B,) per-sample scale factor."""
    B = x.shape[0]
    N = math.prod(x.shape[1:])
    itemsize = jnp.dtype(x.dtype).itemsize

    xf = x.reshape(B, N)                         # free reshape, no transpose
    maskf = mask.reshape(B, 1).astype(x.dtype)   # per-sample scale, x.dtype

    bblk, n_tile = _choose_tiles(B, N, itemsize)
    grid = (B // bblk, N // n_tile)

    block_bytes = bblk * n_tile * itemsize
    # in + out, double-buffered, plus headroom; stay within v7x's 64 MiB.
    vmem_limit = int(min(64 << 20, max(32 << 20, 6 * block_bytes)))

    out = pl.pallas_call(
        _drop_path_kernel,
        out_shape=jax.ShapeDtypeStruct((B, N), x.dtype),
        grid_spec=pltpu.PrefetchScalarGridSpec(
            num_scalar_prefetch=0,
            grid=grid,
            in_specs=[
                pl.BlockSpec((bblk, 1), lambda i, j: (i, 0)),       # mask
                pl.BlockSpec((bblk, n_tile), lambda i, j: (i, j)),  # x
            ],
            out_specs=pl.BlockSpec((bblk, n_tile), lambda i, j: (i, j)),
        ),
        compiler_params=pltpu.CompilerParams(
            dimension_semantics=("parallel", "parallel"),  # independent blocks
            vmem_limit_bytes=vmem_limit,
        ),
        cost_estimate=pl.CostEstimate(
            flops=B * N,
            transcendentals=0,
            bytes_accessed=2 * B * N * itemsize + B * itemsize,
        ),
    )(maskf, xf)
    return out.reshape(x.shape)


def drop_path_pallas(x, drop_prob=0.0, training=False, scale_by_keep=True,
                     key=None, seed=0):
    """Forward of the DropPath module (matches the torch reference)."""
    if drop_prob == 0.0 or not training:
        return x                                 # identity, same as torch
    keep_prob = 1.0 - drop_prob
    if key is None:
        key = jax.random.PRNGKey(seed)
    B = x.shape[0]
    keep = jax.random.bernoulli(key, p=keep_prob, shape=(B,)).astype(x.dtype)
    if scale_by_keep and keep_prob > 0.0:
        keep = keep / jnp.asarray(keep_prob, dtype=x.dtype)
    return _drop_path_call(x, keep)


if __name__ == "__main__":
    key = jax.random.PRNGKey(0)
    kx, kmask, kmask2 = jax.random.split(key, 3)
    x = jax.random.normal(kx, (2, 4, 16, 16), jnp.float32)

    # 1) eval mode / drop_prob == 0 -> exact identity (module default).
    y_eval = jax.block_until_ready(
        drop_path_pallas(x, drop_prob=0.3, training=False, key=kmask))
    assert jnp.array_equal(y_eval, x)
    y_zero = jax.block_until_ready(
        drop_path_pallas(x, drop_prob=0.0, training=True, key=kmask))
    assert jnp.array_equal(y_zero, x)

    # 2) kernel identity path: mask of ones -> output == input.
    y_id = jax.block_until_ready(
        _drop_path_call(x, jnp.ones((x.shape[0],), x.dtype)))
    assert jnp.allclose(y_id, x, atol=1e-6, rtol=1e-6)

    # 3) training: each sample is either zeroed or scaled by 1/keep_prob.
    drop_prob = 0.3
    keep_prob = 1.0 - drop_prob
    y_tr = jax.block_until_ready(
        drop_path_pallas(x, drop_prob=drop_prob, training=True,
                         scale_by_keep=True, key=kmask))
    for b in range(x.shape[0]):
        dropped = bool(jnp.max(jnp.abs(y_tr[b])) == 0.0)
        kept = bool(jnp.allclose(y_tr[b], x[b] / keep_prob, atol=1e-5, rtol=1e-5))
        assert dropped or kept, f"sample {b}: not a valid drop-path output"

    # 4) larger batch, scale_by_keep=False: each sample is exactly 0 or x.
    xb = jax.random.normal(jax.random.PRNGKey(1), (16, 4, 16, 16), jnp.float32)
    y2 = jax.block_until_ready(
        drop_path_pallas(xb, drop_prob=0.5, training=True,
                         scale_by_keep=False, key=kmask2))
    for b in range(xb.shape[0]):
        dropped = bool(jnp.max(jnp.abs(y2[b])) == 0.0)
        kept = bool(jnp.allclose(y2[b], xb[b], atol=1e-6, rtol=1e-6))
        assert dropped or kept, f"sample {b}: not a valid drop-path output"

    print("KERNEL_OK")
</pallas_src>

<mosaic_0001>
module attributes {stable_mosaic.version = 11 : i64} {
  func.func @_drop_path_kernel(%arg0: i32, %arg1: i32, %arg2: memref<2x1xf32, #tpu.memory_space<vmem>>, %arg3: memref<2x1024xf32, #tpu.memory_space<vmem>>, %arg4: memref<2x1024xf32, #tpu.memory_space<vmem>>) attributes {dimension_semantics = [#tpu.dimension_semantics<parallel>, #tpu.dimension_semantics<parallel>], iteration_bounds = array<i64: 1, 1>, scalar_prefetch = 0 : i64, scratch_operands = 0 : i64, tpu.core_type = #tpu.core_type<tc>, window_params = [{transform_indices = @transform_0, window_bounds = array<i64: 2, 1>}, {transform_indices = @transform_1, window_bounds = array<i64: 2, 1024>}, {transform_indices = @transform_2, window_bounds = array<i64: 2, 1024>}]} {
    %c0 = arith.constant 0 : index
    %c0_0 = arith.constant 0 : index
    %0 = vector.load %arg3[%c0, %c0_0] : memref<2x1024xf32, #tpu.memory_space<vmem>>, vector<2x1024xf32>
    %c0_1 = arith.constant 0 : index
    %c0_2 = arith.constant 0 : index
    %1 = vector.load %arg2[%c0_1, %c0_2] : memref<2x1xf32, #tpu.memory_space<vmem>>, vector<2x1xf32>
    %2 = vector.broadcast %1 : vector<2x1xf32> to vector<2x1024xf32>
    %3 = arith.mulf %0, %2 : vector<2x1024xf32>
    %c0_3 = arith.constant 0 : index
    %c0_4 = arith.constant 0 : index
    %4 = vector.load %arg4[%c0_3, %c0_4] : memref<2x1024xf32, #tpu.memory_space<vmem>>, vector<2x1024xf32>
    tpu.vector_store %arg4[%c0_3, %c0_4], %3 {strides = array<i32>} : memref<2x1024xf32, #tpu.memory_space<vmem>>, vector<2x1024xf32>,
    return
  }
  func.func @transform_0(%arg0: i32, %arg1: i32) -> (i32, i32) {
    %c0_i32 = arith.constant 0 : i32
    %c0_i32_0 = arith.constant 0 : i32
    return %arg0, %c0_i32 : i32, i32
  }
  func.func @transform_1(%arg0: i32, %arg1: i32) -> (i32, i32) {
    %c0_i32 = arith.constant 0 : i32
    return %arg0, %arg1 : i32, i32
  }
  func.func @transform_2(%arg0: i32, %arg1: i32) -> (i32, i32) {
    %c0_i32 = arith.constant 0 : i32
    return %arg0, %arg1 : i32, i32
  }
}

</mosaic_0001>

<bundles_post_ra>
// kernel: tpu_custom_call.1
= control target key start
LH: loop header
LB: loop body
LE: loop exit
PB: predicated region body
PF: predicated region fallthrough
CT: control target
= control target key end

     0   :  { %7 = vsyncpa [#allocation3], 0  ;;  %s135_s0 = inlined_call_operand.vmem [shape: f32[2,1], index: 0, kind: input, shape index: {}]   ;;  %s136_s1 = inlined_call_operand.hbm [shape: f32[2,1024], index: 1, kind: input, shape index: {}]   ;;  %s137_s2 = inlined_call_operand.hbm [shape: f32[2,1024], index: 2, kind: output, shape index: {}]  }
   0x1   :  { %8 = vsyncpa [#allocation4], 0  ;;  %s107_s9 = smov [#allocation2]  }
   0x2   :  { %s17_s10 = sshll.u32 %s107_s9, 4  ;;  %s18_s10 = int_to_ptr.vmem [resolvable:$true] %s17_s10 }
   0x3   :  { %s71_s11 = scalar_lea.vmem %s18_s10, 256  ;;  %p76_p1 = scmp.lt.s32.totalorder %s18_s10, %s18_s10 }
   0x4   :  { %p72_p0 = scmp.ne.s32.totalorder %s18_s10, %s71_s11  ;;  %p77_p2 = scmp.lt.s32.totalorder %s71_s11, %s71_s11 }
   0x6   :  { %p78_p3 = por %p77_p2, %p76_p1 }
   0x8   :  { %p79_p4 = pnand %p78_p3, %p72_p0 }
   0xa   :  { %82 = shalt.err (!%p79_p4)
}
   0xb   :  { %20 = dma.hbm_to_vmem [thread:$0]  %s136_s1, 256, %s18_s10, [#allocation3]  }
   0xc   :  { %103 = dma.done.wait [#allocation3], 256  }
   0xd   :  { %104 = vsyncadd [#allocation3], 4294967040  ;;  %v108_v0 = vmov 0   ;;  %v26_v1 = vld [vmem:[%s135_s0] sm:$0x3]  ;;  %v34_v4 = vlaneseq  ;;  %v25_v10 = vld [vmem:[#allocation2 + $0x8] sm:$0xff] }
   0xe   :  { %62 = vset.pattern.permute.xlu0 %v108_v0  ;;  %v109_v2 = vmov 269488144   ;;  %v24_v9 = vld [vmem:[#allocation2] sm:$0xff]  ;;  %s110_s16 = smov [#allocation5]  }
   0xf   :  { %29 = vperm.xlu0 %62, %v26_v1   ;;  %v32_v3 = vunpack.c.l.s4 %v109_v2  ;;  %v35_v6 = vshrl.u32 %v34_v4, 7  ;;  %s49_s1 = sshll.u32 %s110_s16, 4  ;;  %s50_s1 = int_to_ptr.vmem [resolvable:$true] %s49_s1 }
  0x10   :  { %s83_s17 = scalar_lea.vmem %s50_s1, 256  ;;  %p88_p6 = scmp.lt.s32.totalorder %s50_s1, %s50_s1 }
  0x11   :  { %v33_v5 = vunpack.c.0.s8 %v32_v3  ;;  %p84_p5 = scmp.ne.s32.totalorder %s50_s1, %s83_s17  ;;  %p89_p7 = scmp.lt.s32.totalorder %s83_s17, %s83_s17 }
  0x13   :  { %v36_v7 = vsub.s32 %v33_v5, %v35_v6  ;;  %p90_p8 = por %p89_p7, %p88_p6 }
  0x15   :  { %p91_p9 = pnand %p90_p8, %p84_p5 }
  0x8a   :  { %v30_v8 = vpop.permute.xlu0 %29 }
  0x8b   :  { %v37_v11 = vrot.slane %v30_v8, %v36_v7 }
  0x8d   :  { %v39_v12 = vmul.f32 %v37_v11, %v24_v9  ;;  %v40_v13 = vmul.f32 %v37_v11, %v25_v10 }
  0x8f   :  { %41 = vst [vmem:[#allocation5] sm:$0xff] %v39_v12  ;;  %42 = vst [vmem:[#allocation5 + $0x8] sm:$0xff] %v40_v13 }
  0x90   :  { %94 = shalt.err (!%p91_p9)
}
  0x91   :  { %52 = dma.vmem_to_hbm [thread:$0]  %s50_s1, 256, %s137_s2, [#allocation4]  }
  0x92   :  { %105 = dma.done.wait [#allocation4], 256  }
  0x93   :  { %106 = vsyncadd [#allocation4], 4294967040 }
  0x94   :  { %56 = vsyncpa [#allocation3], 1 }
  0x95   :  { %57 = vsyncpa [#allocation4], 1 }

</bundles_post_ra>
